<compile_context>
chip_gen: v7x
topology: tpu7x:2x2x1
jax: 0.10.0
libtpu: 0.0.40
codegen_flags: <defaults>
</compile_context>

<pallas_src>
import functools

import jax
import jax.numpy as jnp
from jax.experimental import pallas as pl
from jax.experimental.pallas import tpu as pltpu


def _round_up(x: int, m: int) -> int:
    return ((x + m - 1) // m) * m


def _cdiv(a: int, b: int) -> int:
    return (a + b - 1) // b


# ---------------------------------------------------------------------------
# Kernels
# ---------------------------------------------------------------------------

def _denorm_single_pass_kernel(x_ref, p_ref, o_ref, *, eps, inv_count,
                               one_minus_alpha):
    """Stats + apply over one (N, TC, HW) channel block.

    p_ref block (2, N, TC, 1) f32:
      p[0] = alpha * gamma * scale
      p[1] = alpha * (beta * scale + offset)
    Per-element work is a single broadcast FMA: y = x * a + b.
    """
    x = x_ref[...]

    # One traversal for both moments; accumulate in f32 (XLU lane reduce).
    s1 = jnp.sum(x, axis=(0, 2), keepdims=True, dtype=jnp.float32)    # (1,TC,1)
    s2 = jnp.sum(x * x, axis=(0, 2), keepdims=True, dtype=jnp.float32)
    mean = s1 * inv_count
    var = jnp.maximum(s2 * inv_count - mean * mean, 0.0)   # biased var (BN train)
    rstd = jax.lax.rsqrt(var + eps)                          # EUP slot

    p = p_ref[...]
    g = p[0] * rstd                                          # (N, TC, 1)
    a = g if one_minus_alpha == 0.0 else g + one_minus_alpha
    b = p[1] - mean * g

    if x.dtype == jnp.float32:
        y = x * a + b
    else:
        # bf16/fp16 path: FMA in the input dtype (bf16 VALU on v6e/v7x);
        # avoids materializing a full f32 copy of the block.
        y = x * a.astype(x.dtype) + b.astype(x.dtype)
    o_ref[...] = y.astype(o_ref.dtype)


def _stats_kernel(x_ref, s1_ref, s2_ref, *, thw, hw_total, needs_mask):
    """Two-pass fallback, pass 1: accumulate per-channel sum / sum-of-squares."""
    h = pl.program_id(1)
    x = x_ref[...].astype(jnp.float32)
    if needs_mask:
        # Partial HW tile: zero OOB lanes so they don't pollute the statistics.
        pos = jax.lax.broadcasted_iota(jnp.int32, x.shape, 2) + h * thw
        x = jnp.where(pos < hw_total, x, 0.0)

    @pl.when(h == 0)
    def _():
        s1_ref[...] = jnp.zeros_like(s1_ref)
        s2_ref[...] = jnp.zeros_like(s2_ref)

    s1_ref[...] += jnp.sum(x, axis=(0, 2), keepdims=True)
    s2_ref[...] += jnp.sum(x * x, axis=(0, 2), keepdims=True)


def _apply_kernel(x_ref, p_ref, o_ref):
    """Two-pass fallback, pass 2: y = x * a + b with host-folded a, b."""
    x = x_ref[...]
    p = p_ref[...]
    a, b = p[0], p[1]
    if x.dtype == jnp.float32:
        y = x * a + b
    else:
        y = x * a.astype(x.dtype) + b.astype(x.dtype)
    o_ref[...] = y.astype(o_ref.dtype)


# ---------------------------------------------------------------------------
# Tiling / VMEM budgeting
# ---------------------------------------------------------------------------

def _vmem_limit_bytes() -> int:
    """Generation-aware scoped-VMEM limit: ~75% of per-core VMEM, <= 96 MiB."""
    cap = 64 * 1024 * 1024            # conservative default (v7x per-core VMEM)
    try:
        info = pltpu.get_tpu_info()
        cap = int(getattr(info, "vmem_capacity_bytes", cap)) or cap
    except Exception:
        pass
    return min(cap * 3 // 4, 96 * 1024 * 1024)


def _block_bytes(N, tc, lanes, in_isz, out_isz):
    """Conservative VMEM footprint of one grid step: double-buffered in/out
    blocks, ~2 block-sized f32 temporaries, and the 128-lane-padded
    (2, N, tc, 1) f32 parameter tiles (double-buffered)."""
    elems = N * tc * lanes
    io = 2 * elems * in_isz + 2 * elems * out_isz
    temps = 2 * elems * 4
    params = 2 * (2 * N * _round_up(tc, 8) * 128 * 4)
    return io + temps + params


def _choose_single_pass_tc(N, C, HW, in_isz, out_isz, budget):
    """Channel block for the single-pass kernel, or None if nothing fits.

    Candidates are multiples of 8 (partial last block is fine: channels are
    independent, OOB output rows are masked) plus a full-C block when C < 8 or
    C % 8 != 0.  For C >= 16 prefer a balanced grid of >= 2 (v7x dual TC).
    """
    if C < 8:
        cands = [C]
    else:
        cands = list(range((C // 8) * 8, 0, -8))
        if C % 8 != 0:
            cands.append(C)
    fitting = [t for t in cands
               if _block_bytes(N, t, HW, in_isz, out_isz) <= budget]
    if not fitting:
        return None
    if C >= 16:
        balanced = _round_up(_cdiv(C, 2), 8)
        split = [t for t in fitting if t <= balanced and _cdiv(C, t) >= 2]
        if split:
            return max(split)
    return max(fitting)


def _choose_two_pass_thw(N, tc, HW, in_isz, out_isz, budget):
    """Spatial (lane) tile for the two-pass fallback: 128-aligned, preferring
    an exact divisor of HW so the stats pass needs no OOB mask."""
    if HW <= 128:
        return HW
    fitting = [t for t in range(128, HW + 1, 128)
               if _block_bytes(N, tc, t, in_isz, out_isz) <= budget]
    if not fitting:
        return 128
    divisors = [t for t in fitting if HW % t == 0]
    return max(divisors) if divisors else max(fitting)


# ---------------------------------------------------------------------------
# Wrapper
# ---------------------------------------------------------------------------

def denorm(x_nchw, gamma, beta, scale, offset, *, eps: float = 1e-9,
           alpha: float = 1.0, donate_input: bool = False,
           _force_two_pass: bool = False):
    """DeNorm forward.  x: (N,C,H,W); gamma/beta: (C,); scale/offset: (N,C,1,1)."""
    N, C, H, W = x_nchw.shape
    HW = H * W
    in_isz = jnp.dtype(x_nchw.dtype).itemsize
    out_isz = in_isz

    # Free reshape (no HBM movement): NCHW -> (N, C, H*W).  HW is the lane dim
    # of every block -> lane-dense stores when H*W is a multiple of 128
    # (small maps like 7x7/14x14 pay a minor masked-vst tax).
    x_ncl = x_nchw.reshape(N, C, HW)

    # Host-side fold of BN affine + denorm scale/offset + alpha into two (N, C)
    # f32 coefficients, packed into ONE param array -> one tiny DMA per step.
    gamma_f = gamma.astype(jnp.float32).reshape(1, C)
    beta_f = beta.astype(jnp.float32).reshape(1, C)
    scale_nc = jnp.broadcast_to(scale, (N, C, 1, 1)).reshape(N, C).astype(jnp.float32)
    offset_nc = jnp.broadcast_to(offset, (N, C, 1, 1)).reshape(N, C).astype(jnp.float32)
    sf = alpha * gamma_f * scale_nc                       # (N, C)
    of = alpha * (beta_f * scale_nc + offset_nc)          # (N, C)

    vmem_limit = _vmem_limit_bytes()
    budget = vmem_limit          # _block_bytes already counts buffers+temps+params
    alias = {0: 0} if donate_input else {}

    tc = None if _force_two_pass else _choose_single_pass_tc(
        N, C, HW, in_isz, out_isz, budget)

    if tc is not None:
        # ---- Single pass: per-channel stats + apply, channel-tiled grid ----
        params = jnp.stack([sf, of], axis=0).reshape(2, N, C, 1)
        kernel = functools.partial(
            _denorm_single_pass_kernel, eps=float(eps),
            inv_count=1.0 / float(N * HW),
            one_minus_alpha=1.0 - float(alpha))
        out_ncl = pl.pallas_call(
            kernel,
            out_shape=jax.ShapeDtypeStruct((N, C, HW), x_nchw.dtype),
            grid=(_cdiv(C, tc),),
            in_specs=[
                pl.BlockSpec((N, tc, HW), lambda c: (0, c, 0)),        # x
                pl.BlockSpec((2, N, tc, 1), lambda c: (0, 0, c, 0)),   # folded params
            ],
            out_specs=pl.BlockSpec((N, tc, HW), lambda c: (0, c, 0)),
            compiler_params=pltpu.CompilerParams(
                dimension_semantics=("parallel",),
                vmem_limit_bytes=vmem_limit),
            input_output_aliases=alias,
        )(x_ncl, params)
        return out_ncl.reshape(N, C, H, W)

    # ---- Two-pass fallback: a whole (N, HW) channel slab does not fit VMEM ----
    tc2 = C if C < 8 else 8
    thw = (min(HW, 128) if _force_two_pass
           else _choose_two_pass_thw(N, tc2, HW, in_isz, out_isz, budget))
    needs_mask = (HW % thw) != 0
    grid2 = (_cdiv(C, tc2), _cdiv(HW, thw))

    stats_kernel = functools.partial(
        _stats_kernel, thw=thw, hw_total=HW, needs_mask=needs_mask)
    s1, s2 = pl.pallas_call(
        stats_kernel,
        out_shape=(jax.ShapeDtypeStruct((1, C, 1), jnp.float32),
                   jax.ShapeDtypeStruct((1, C, 1), jnp.float32)),
        grid=grid2,
        in_specs=[pl.BlockSpec((N, tc2, thw), lambda c, h: (0, c, h))],
        out_specs=(pl.BlockSpec((1, tc2, 1), lambda c, h: (0, c, 0)),
                   pl.BlockSpec((1, tc2, 1), lambda c, h: (0, c, 0))),
        compiler_params=pltpu.CompilerParams(
            dimension_semantics=("parallel", "arbitrary"),
            vmem_limit_bytes=vmem_limit),
    )(x_ncl)

    # Tiny host-side fold of the stats into the per-(N, C) FMA coefficients.
    inv_count = 1.0 / float(N * HW)
    mean_c = s1.reshape(1, C) * inv_count
    var_c = jnp.maximum(s2.reshape(1, C) * inv_count - mean_c * mean_c, 0.0)
    rstd_c = jax.lax.rsqrt(var_c + eps)
    g = sf * rstd_c
    a = g if alpha == 1.0 else g + (1.0 - float(alpha))
    b = of - mean_c * g
    params2 = jnp.stack([a, b], axis=0).reshape(2, N, C, 1)

    out_ncl = pl.pallas_call(
        _apply_kernel,
        out_shape=jax.ShapeDtypeStruct((N, C, HW), x_nchw.dtype),
        grid=grid2,
        in_specs=[
            pl.BlockSpec((N, tc2, thw), lambda c, h: (0, c, h)),
            pl.BlockSpec((2, N, tc2, 1), lambda c, h: (0, 0, c, 0)),
        ],
        out_specs=pl.BlockSpec((N, tc2, thw), lambda c, h: (0, c, h)),
        compiler_params=pltpu.CompilerParams(
            dimension_semantics=("parallel", "parallel"),
            vmem_limit_bytes=vmem_limit),
        input_output_aliases=alias,
    )(x_ncl, params2)
    return out_ncl.reshape(N, C, H, W)


def denorm_ref(x, gamma, beta, scale, offset, *, eps=1e-9, alpha=1.0):
    """Pure-JAX reference matching the PyTorch forward."""
    mean = jnp.mean(x, axis=(0, 2, 3), keepdims=True)
    var = jnp.mean((x - mean) ** 2, axis=(0, 2, 3), keepdims=True)
    xn = (x - mean) / jnp.sqrt(var + eps)
    y = xn * gamma.reshape(1, -1, 1, 1) + beta.reshape(1, -1, 1, 1)
    y = y * scale + offset
    if alpha == 1.0:
        return y
    return alpha * y + (1 - alpha) * x


if __name__ == "__main__":
    N, C, H, W = 2, 4, 16, 16
    key = jax.random.PRNGKey(0)
    kx, ks, ko = jax.random.split(key, 3)

    x = jax.random.normal(kx, (N, C, H, W), dtype=jnp.float32)
    # BatchNorm2d default affine init (deterministic): weight=1, bias=0.
    gamma = jnp.ones((C,), dtype=jnp.float32)
    beta = jnp.zeros((C,), dtype=jnp.float32)
    scale = jax.random.normal(ks, (N, C, 1, 1), dtype=jnp.float32)
    offset = jax.random.normal(ko, (N, C, 1, 1), dtype=jnp.float32)

    ok = True
    for alpha in (1.0, 0.7):
        out = jax.block_until_ready(
            denorm(x, gamma, beta, scale, offset, alpha=alpha))
        ref = denorm_ref(x, gamma, beta, scale, offset, alpha=alpha)
        ok &= bool(jnp.allclose(out, ref, atol=1e-4, rtol=1e-4))

    # Exercise the two-pass (HW-tiled) fallback path as well.
    out2 = jax.block_until_ready(
        denorm(x, gamma, beta, scale, offset, alpha=0.7, _force_two_pass=True))
    ref2 = denorm_ref(x, gamma, beta, scale, offset, alpha=0.7)
    ok &= bool(jnp.allclose(out2, ref2, atol=1e-4, rtol=1e-4))

    print("KERNEL_OK" if ok else "KERNEL_MISMATCH")
</pallas_src>

<mosaic_0001>
module attributes {stable_mosaic.version = 11 : i64} {
  func.func @_denorm_single_pass_kernel(%arg0: i32, %arg1: memref<2x4x256xf32, #tpu.memory_space<vmem>>, %arg2: memref<2x2x4x1xf32, #tpu.memory_space<vmem>>, %arg3: memref<2x4x256xf32, #tpu.memory_space<vmem>>) attributes {dimension_semantics = [#tpu.dimension_semantics<parallel>], iteration_bounds = array<i64: 1>, scalar_prefetch = 0 : i64, scratch_operands = 0 : i64, tpu.core_type = #tpu.core_type<tc>, window_params = [{transform_indices = @transform_0, window_bounds = array<i64: 2, 4, 256>}, {transform_indices = @transform_1, window_bounds = array<i64: 2, 2, 4, 1>}, {transform_indices = @transform_2, window_bounds = array<i64: 2, 4, 256>}]} {
    %c0 = arith.constant 0 : index
    %c0_0 = arith.constant 0 : index
    %c0_1 = arith.constant 0 : index
    %0 = vector.load %arg1[%c0, %c0_0, %c0_1] : memref<2x4x256xf32, #tpu.memory_space<vmem>>, vector<2x4x256xf32>
    %cst = arith.constant dense<0.000000e+00> : vector<4xf32>
    %1 = vector.multi_reduction <add>, %0, %cst [0, 2] : vector<2x4x256xf32> to vector<4xf32>
    %2 = vector.shape_cast %1 : vector<4xf32> to vector<1x4x1xf32>
    %3 = arith.mulf %0, %0 : vector<2x4x256xf32>
    %cst_2 = arith.constant dense<0.000000e+00> : vector<4xf32>
    %4 = vector.multi_reduction <add>, %3, %cst_2 [0, 2] : vector<2x4x256xf32> to vector<4xf32>
    %5 = vector.shape_cast %4 : vector<4xf32> to vector<1x4x1xf32>
    %cst_3 = arith.constant 0.001953125 : f32
    %6 = vector.broadcast %cst_3 : f32 to vector<1x4x1xf32>
    %7 = arith.mulf %2, %6 : vector<1x4x1xf32>
    %cst_4 = arith.constant 0.001953125 : f32
    %8 = vector.broadcast %cst_4 : f32 to vector<1x4x1xf32>
    %9 = arith.mulf %5, %8 : vector<1x4x1xf32>
    %10 = arith.mulf %7, %7 : vector<1x4x1xf32>
    %11 = arith.subf %9, %10 : vector<1x4x1xf32>
    %cst_5 = arith.constant 0.000000e+00 : f32
    %12 = vector.broadcast %cst_5 : f32 to vector<1x4x1xf32>
    %13 = arith.maximumf %11, %12 : vector<1x4x1xf32>
    %cst_6 = arith.constant 9.99999971E-10 : f32
    %14 = vector.broadcast %cst_6 : f32 to vector<1x4x1xf32>
    %15 = arith.addf %13, %14 : vector<1x4x1xf32>
    %16 = math.rsqrt %15 : vector<1x4x1xf32>
    %c0_7 = arith.constant 0 : index
    %c0_8 = arith.constant 0 : index
    %c0_9 = arith.constant 0 : index
    %c0_10 = arith.constant 0 : index
    %17 = vector.load %arg2[%c0_7, %c0_8, %c0_9, %c0_10] : memref<2x2x4x1xf32, #tpu.memory_space<vmem>>, vector<2x2x4x1xf32>
    %18 = vector.extract_strided_slice %17 {offsets = [0, 0, 0, 0], sizes = [1, 2, 4, 1], strides = [1, 1, 1, 1]} : vector<2x2x4x1xf32> to vector<1x2x4x1xf32>
    %19 = vector.shape_cast %18 : vector<1x2x4x1xf32> to vector<2x4x1xf32>
    %20 = vector.broadcast %16 : vector<1x4x1xf32> to vector<2x4x1xf32>
    %21 = arith.mulf %19, %20 : vector<2x4x1xf32>
    %22 = vector.extract_strided_slice %17 {offsets = [1, 0, 0, 0], sizes = [1, 2, 4, 1], strides = [1, 1, 1, 1]} : vector<2x2x4x1xf32> to vector<1x2x4x1xf32>
    %23 = vector.shape_cast %22 : vector<1x2x4x1xf32> to vector<2x4x1xf32>
    %24 = vector.broadcast %7 : vector<1x4x1xf32> to vector<2x4x1xf32>
    %25 = arith.mulf %24, %21 : vector<2x4x1xf32>
    %26 = arith.subf %23, %25 : vector<2x4x1xf32>
    %27 = vector.broadcast %21 : vector<2x4x1xf32> to vector<2x4x256xf32>
    %28 = arith.mulf %0, %27 : vector<2x4x256xf32>
    %29 = vector.broadcast %26 : vector<2x4x1xf32> to vector<2x4x256xf32>
    %30 = arith.addf %28, %29 : vector<2x4x256xf32>
    %c0_11 = arith.constant 0 : index
    %c0_12 = arith.constant 0 : index
    %c0_13 = arith.constant 0 : index
    %31 = vector.load %arg3[%c0_11, %c0_12, %c0_13] : memref<2x4x256xf32, #tpu.memory_space<vmem>>, vector<2x4x256xf32>
    tpu.vector_store %arg3[%c0_11, %c0_12, %c0_13], %30 {strides = array<i32>} : memref<2x4x256xf32, #tpu.memory_space<vmem>>, vector<2x4x256xf32>,
    return
  }
  func.func @transform_0(%arg0: i32) -> (i32, i32, i32) {
    %c0_i32 = arith.constant 0 : i32
    %c0_i32_0 = arith.constant 0 : i32
    %c0_i32_1 = arith.constant 0 : i32
    return %c0_i32, %arg0, %c0_i32_0 : i32, i32, i32
  }
  func.func @transform_1(%arg0: i32) -> (i32, i32, i32, i32) {
    %c0_i32 = arith.constant 0 : i32
    %c0_i32_0 = arith.constant 0 : i32
    %c0_i32_1 = arith.constant 0 : i32
    %c0_i32_2 = arith.constant 0 : i32
    return %c0_i32, %c0_i32_0, %arg0, %c0_i32_1 : i32, i32, i32, i32
  }
  func.func @transform_2(%arg0: i32) -> (i32, i32, i32) {
    %c0_i32 = arith.constant 0 : i32
    %c0_i32_0 = arith.constant 0 : i32
    %c0_i32_1 = arith.constant 0 : i32
    return %c0_i32, %arg0, %c0_i32_0 : i32, i32, i32
  }
}

</mosaic_0001>

<bundles_post_ra>
// kernel: tpu_custom_call.1
= control target key start
LH: loop header
LB: loop body
LE: loop exit
PB: predicated region body
PF: predicated region fallthrough
CT: control target
= control target key end

     0   :  { %vm20_vm0 = vcmask 1043456   ;;  %s243_s0 = inlined_call_operand.vmem [shape: f32[2,4,256], index: 0, kind: input, shape index: {}]   ;;  %s244_s1 = inlined_call_operand.vmem [shape: f32[2,2,4,1], index: 1, kind: input, shape index: {}]   ;;  %s245_s2 = inlined_call_operand.hbm [shape: f32[2,4,256], index: 2, kind: output, shape index: {}]  }
   0x1   :  { %v192_v0 = vld [vmem:[%s243_s0] sm:$0xff]  ;;  %v197_v1 = vld [vmem:[%s243_s0 + $0x8] sm:$0xff] }
   0x2   :  { %7 = vsyncpa [#allocation3], 0  ;;  %v16_v2 = vcombine.high %v192_v0, %v192_v0  ;;  %v17_v3 = vcombine.high %v197_v1, %v197_v1  ;;  %v21_v4 = vsel %vm20_vm0, %v192_v0, 0.0  ;;  %v30_v5 = vmul.f32 %v192_v0, %v192_v0  ;;  %v54_v31 = vld [vmem:[%s244_s1] sm:$0xf] }
   0x3   :  { %v31_v6 = vmul.f32 %v197_v1, %v197_v1  ;;  %v24_v8 = vsel %vm20_vm0, %v197_v1, 0.0  ;;  %v169_v22 = vmov 0   ;;  %v55_v32 = vld [vmem:[%s244_s1 + $0x4] sm:$0xf]  ;;  %v56_v36 = vld [vmem:[%s244_s1 + $0x8] sm:$0xf]  ;;  %v75_v44 = vlaneseq }
   0x4   :  { %v22_v7 = vsel %vm20_vm0, %v16_v2, 0.0  ;;  %v34_v10 = vcombine.high %v30_v5, %v30_v5  ;;  %v38_v12 = vsel %vm20_vm0, %v30_v5, 0.0  ;;  %v26_v13 = vsel %vm20_vm0, %v17_v3, 0.0  ;;  %139 = vset.pattern.permute.xlu1 %v169_v22  ;;  %140 = vset.pattern.permute.xlu0 %v169_v22  ;;  %v57_v40 = vld [vmem:[%s244_s1 + $0xc] sm:$0xf]  ;;  %s171_s1 = smov [#allocation2]  }
   0x5   :  { %v23_v9 = vadd.f32 %v22_v7, %v21_v4  ;;  %v35_v11 = vcombine.high %v31_v6, %v31_v6  ;;  %v41_v16 = vsel %vm20_vm0, %v31_v6, 0.0  ;;  %v170_v42 = vmov 839922192   ;;  %s123_s20 = sshll.u32 %s171_s1, 4  ;;  %s124_s20 = int_to_ptr.vmem [resolvable:$true] %s123_s20 }
   0x6   :  { %v39_v15 = vsel %vm20_vm0, %v34_v10, 0.0  ;;  %v73_v43 = vunpack.c.l.s4 %v170_v42  ;;  %v76_v46 = vshrl.u32 %v75_v44, 7  ;;  %s145_s21 = scalar_lea.vmem %s124_s20, 256  ;;  %p150_p1 = scmp.lt.s32.totalorder %s124_s20, %s124_s20 }
   0x7   :  { %v25_v14 = vadd.f32 %v24_v8, %v23_v9  ;;  %v40_v17 = vadd.f32 %v39_v15, %v38_v12  ;;  %v43_v19 = vsel %vm20_vm0, %v35_v11, 0.0  ;;  %p146_p0 = scmp.ne.s32.totalorder %s124_s20, %s145_s21  ;;  %p151_p2 = scmp.lt.s32.totalorder %s145_s21, %s145_s21 }
   0x8   :  { %v74_v45 = vunpack.c.0.s8 %v73_v43 }
   0x9   :  { %v27_v18 = vadd.f32 %v26_v13, %v25_v14  ;;  %v42_v20 = vadd.f32 %v41_v16, %v40_v17  ;;  %p152_p3 = por %p151_p2, %p150_p1 }
   0xa   :  { %v77_v47 = vsub.s32 %v74_v45, %v76_v46 }
   0xb   :  { %28 = vadd.xlane.f32.xlu0 %v27_v18  ;;  %v44_v21 = vadd.f32 %v43_v19, %v42_v20  ;;  %p153_p4 = pnand %p152_p3, %p146_p0 }
   0xf   :  { %45 = vadd.xlane.f32.xlu0 %v44_v21 }
  0x98   :  { %v29_v23 = vpop.xlane.xlu0 %28 }
  0x99   :  { %v47_v24 = vmul.f32 0.001953125, %v29_v23 }
  0x9b   :  { %v49_v26 = vmul.f32 %v47_v24, %v47_v24 }
  0x9c   :  { %v46_v25 = vpop.xlane.xlu0 %45 }
  0x9d   :  { %v48_v27 = vmul.f32 0.001953125, %v46_v25 }
  0x9f   :  { %v50_v28 = vsub.f32 %v48_v27, %v49_v26 }
  0xa1   :  { %v51_v29 = vmax.f32 %v50_v28, 0.0 }
  0xa3   :  { %v52_v30 = vadd.f32 1e-09, %v51_v29 }
  0xa5   :  { %143 = vrsqrt.f32 %v52_v30 }
  0xaf   :  { %v144_v33 = vpop.eup %143 }
  0xb0   :  { %v58_v34 = vmul.f32 %v144_v33, %v54_v31  ;;  %v59_v35 = vmul.f32 %v144_v33, %v55_v32 }
  0xb2   :  { %66 = vperm.xlu1 %139, %v58_v34   ;;  %v60_v37 = vmul.f32 %v58_v34, %v47_v24  ;;  %v61_v39 = vmul.f32 %v59_v35, %v47_v24 }
  0xb4   :  { %v62_v38 = vsub.f32 %v56_v36, %v60_v37  ;;  %v63_v41 = vsub.f32 %v57_v40, %v61_v39 }
  0xb6   :  { %70 = vperm.xlu1 %139, %v59_v35   ;;  %92 = vperm.xlu0 %140, %v62_v38  }
  0xba   :  { %96 = vperm.xlu1 %139, %v63_v41  }
 0x131   :  { %v67_v48 = vpop.permute.xlu1 %66 }
 0x132   :  { %v78_v49 = vrot.slane %v67_v48, %v77_v47 }
 0x134   :  { %v88_v52 = vmul.f32 %v78_v49, %v192_v0 }
 0x135   :  { %v71_v50 = vpop.permute.xlu1 %70  ;;  %v93_v51 = vpop.permute.xlu0 %92 }
 0x136   :  { %v85_v53 = vrot.slane %v71_v50, %v77_v47  ;;  %v104_v54 = vrot.slane %v93_v51, %v77_v47 }
 0x138   :  { %v114_v55 = vadd.f32 %v104_v54, %v88_v52  ;;  %v89_v57 = vmul.f32 %v85_v53, %v197_v1 }
 0x139   :  { %v97_v56 = vpop.permute.xlu1 %96 }
 0x13a   :  { %116 = vst [vmem:[#allocation2] sm:$0xff] %v114_v55  ;;  %v111_v58 = vrot.slane %v97_v56, %v77_v47 }
 0x13c   :  { %v115_v59 = vadd.f32 %v111_v58, %v89_v57 }
 0x13e   :  { %117 = vst [vmem:[#allocation2 + $0x8] sm:$0xff] %v115_v59 }
 0x13f   :  { %156 = shalt.err (!%p153_p4)
}
 0x140   :  { %s157_s24 = scalar_lea.hbm %s245_s2, 256 }
 0x141   :  { %p158_p5 = scmp.ne.s32.totalorder %s245_s2, %s157_s24  ;;  %p161_p6 = scmp.lt.u32.totalorder %s157_s24, %s245_s2 }
 0x143   :  { %p163_p7 = pnand %p161_p6, %p158_p5 }
 0x145   :  { %166 = shalt.err (!%p163_p7)
}
 0x146   :  { %s172_s29 = smov 128   ;;  %s173_s30 = smov 8  }
 0x147   :  { %129 = dma.vmem_to_hbm [thread:$0]  %s124_s20, 256, %s245_s2, [#allocation3], %s172_s29, %s172_s29, %s173_s30  }
 0x148   :  { %167 = dma.done.wait [#allocation3], 256  }
 0x149   :  { %168 = vsyncadd [#allocation3], 4294967040 }
 0x14a   :  { %133 = vsyncpa [#allocation3], 1 }

</bundles_post_ra>
